<compile_context>
chip_gen: v6e
topology: v6e:2x2x1
jax: 0.10.0
libtpu: 0.0.40
codegen_flags: <defaults>
</compile_context>

<pallas_src>
import functools
from typing import NamedTuple

import jax
import jax.numpy as jnp
from jax import lax
from jax.experimental import pallas as pl
from jax.experimental.pallas import tpu as pltpu


def _round_up(x, m):
    return (x + m - 1) // m * m


# ---------------------------------------------------------------------------
# Kernel
# ---------------------------------------------------------------------------
def _lora_linear_kernel(scale_ref, x_ref, w_ref, a_ref, b_ref, o_ref,
                        acc_ref, aacc_ref, *, reuse_down_proj):
    """Grid = (M/tm, N/tn, K/tk); K is the (last, 'arbitrary') reduction axis.

    scale_ref: (1,) f32 in SMEM       lora_scale
    x_ref   : (tm, tk)                activation tile
    w_ref   : (tk, tn)                frozen weight tile, pre-transposed (K, N)
    a_ref   : (tk, rank)              LoRA down-proj tile, pre-transposed (K, r)
    b_ref   : (rank, tn)              LoRA up-proj tile, pre-transposed (r, N)
    acc_ref : (tm, tn)   f32          accumulator for x @ W
    aacc_ref: (tm, rank) f32          accumulator for x @ A
    """
    j = pl.program_id(1)
    k = pl.program_id(2)
    nk = pl.num_programs(2)

    @pl.when(k == 0)
    def _init():
        acc_ref[...] = jnp.zeros_like(acc_ref)

    x = x_ref[...]
    mm = (((1,), (0,)), ((), ()))  # canonical: LHS minor x RHS major

    # Base path partial sum: x @ W  (W is pre-transposed -> no RHS transpose).
    acc_ref[...] += lax.dot_general(x, w_ref[...], mm,
                                    preferred_element_type=jnp.float32)

    def _down_proj():
        @pl.when(k == 0)
        def _():
            aacc_ref[...] = jnp.zeros_like(aacc_ref)
        aacc_ref[...] += lax.dot_general(x, a_ref[...], mm,
                                         preferred_element_type=jnp.float32)

    if reuse_down_proj:
        # N axis serialized on this core: compute x @ A only on the first
        # N tile of each row block; reuse the f32 result for every j > 0.
        pl.when(j == 0)(_down_proj)
    else:
        # N axis may be sharded across cores (decode-size M): recompute.
        _down_proj()

    @pl.when(k == nk - 1)
    def _finalize():
        scale = scale_ref[0]
        # Scale the tiny (tm, rank) intermediate, up-project in f32 (rank is
        # tiny, epilogue-only) so the LoRA path keeps f32 accumulation even
        # with bf16 compute_dtype.
        a_scaled = aacc_ref[...] * scale
        b_out = lax.dot_general(a_scaled, b_ref[...].astype(jnp.float32), mm,
                                preferred_element_type=jnp.float32)
        o_ref[...] = (acc_ref[...] + b_out).astype(o_ref.dtype)


# ---------------------------------------------------------------------------
# One-time (load-time) weight preparation
# ---------------------------------------------------------------------------
class LoraWeights(NamedTuple):
    Wt: jax.Array          # (Kp, Np)  frozen weight, transposed + padded
    At: jax.Array          # (Kp, rank)
    Bt: jax.Array          # (rank, Np)
    in_features: int
    out_features: int
    rank: int
    tn: int                # effective N tile
    tk: int                # effective K tile


def prepare_lora_weights(W, A, B, *, tn=1024, tk=512, compute_dtype=None):
    """Transpose frozen weights to MXU-canonical RHS layout (K-major), pad
    out/in dims to tile multiples, and cast — ONCE.  Call at load time."""
    N, K = W.shape
    rank = A.shape[0]
    assert A.shape == (rank, K), A.shape
    assert B.shape == (N, rank), B.shape

    dtype = compute_dtype if compute_dtype is not None else W.dtype
    tn_e = min(tn, _round_up(N, 128))
    tk_e = min(tk, _round_up(K, 128))
    Np = _round_up(N, tn_e)
    Kp = _round_up(K, tk_e)

    Wt = jnp.pad(W.T.astype(dtype), ((0, Kp - K), (0, Np - N)))   # (Kp, Np)
    At = jnp.pad(A.T.astype(dtype), ((0, Kp - K), (0, 0)))        # (Kp, rank)
    Bt = jnp.pad(B.T.astype(dtype), ((0, 0), (0, Np - N)))        # (rank, Np)
    return LoraWeights(Wt, At, Bt, K, N, rank, tn_e, tk_e)


# ---------------------------------------------------------------------------
# Per-call forward
# ---------------------------------------------------------------------------
def lora_linear_prepared(x, weights: LoraWeights, lora_scale=1.0, *,
                         tm=512, out_dtype=None):
    """Forward with pre-prepared weights.  Only the activations are padded /
    cast per call."""
    K, N, rank = weights.in_features, weights.out_features, weights.rank
    assert x.shape[-1] == K
    if out_dtype is None:
        out_dtype = x.dtype
    compute_dtype = weights.Wt.dtype
    lead_shape = x.shape[:-1]

    x2d = x.reshape(-1, K).astype(compute_dtype)
    M = x2d.shape[0]
    Kp, Np = weights.Wt.shape
    tn_e, tk_e = weights.tn, weights.tk
    tm_e = min(tm, _round_up(M, 8))
    Mp = _round_up(M, tm_e)
    if (Mp, Kp) != (M, K):
        x2d = jnp.pad(x2d, ((0, Mp - M), (0, Kp - K)))

    grid = (Mp // tm_e, Np // tn_e, Kp // tk_e)
    grid_m = grid[0]

    if grid_m >= 2:
        # Megacore shards rows; N serialized on a core -> reuse x @ A.
        dims = ("parallel", "arbitrary", "arbitrary")
        reuse_down = True
    else:
        # Single row block: keep N parallel so both v7x TCs get work.
        dims = ("parallel", "parallel", "arbitrary")
        reuse_down = False

    # --- VMEM budget (lane/sublane-padding aware) ---
    def lane(n):
        return max(_round_up(n, 128), 128)

    def sub(n):
        return max(_round_up(n, 8), 8)

    itb = jnp.dtype(compute_dtype).itemsize
    otb = jnp.dtype(out_dtype).itemsize
    est = (2 * sub(tm_e) * lane(tk_e) * itb          # x tiles (double buffered)
           + 2 * sub(tk_e) * lane(tn_e) * itb        # W tiles
           + 2 * sub(tk_e) * lane(rank) * itb        # A tiles
           + 2 * sub(rank) * lane(tn_e) * itb        # B tiles
           + 2 * sub(tm_e) * lane(tn_e) * otb        # output tiles
           + sub(tm_e) * lane(tn_e) * 4              # acc scratch (f32)
           + sub(tm_e) * lane(rank) * 4)             # aacc scratch (f32)
    try:
        vmem_cap = int(getattr(pltpu.get_tpu_info(), "vmem_capacity_bytes"))
    except Exception:
        vmem_cap = 64 * 1024 * 1024                  # conservative (v7x per-TC)
    vmem_limit = int(min(int(vmem_cap * 0.85),
                         max(2 * est, 32 * 1024 * 1024)))

    scale = jnp.asarray([lora_scale], dtype=jnp.float32)
    kernel = functools.partial(_lora_linear_kernel, reuse_down_proj=reuse_down)

    out2d = pl.pallas_call(
        kernel,
        out_shape=jax.ShapeDtypeStruct((Mp, Np), out_dtype),
        grid_spec=pltpu.PrefetchScalarGridSpec(
            num_scalar_prefetch=0,
            grid=grid,
            in_specs=[
                pl.BlockSpec(memory_space=pltpu.MemorySpace.SMEM),      # scale
                pl.BlockSpec((tm_e, tk_e), lambda i, j, k: (i, k)),     # x
                pl.BlockSpec((tk_e, tn_e), lambda i, j, k: (k, j)),     # W (K,N)
                pl.BlockSpec((tk_e, rank), lambda i, j, k: (k, 0)),     # A (K,r)
                pl.BlockSpec((rank, tn_e), lambda i, j, k: (0, j)),     # B (r,N)
            ],
            out_specs=pl.BlockSpec((tm_e, tn_e), lambda i, j, k: (i, j)),
            scratch_shapes=[
                pltpu.VMEM((tm_e, tn_e), jnp.float32),   # x @ W accumulator
                pltpu.VMEM((tm_e, rank), jnp.float32),   # x @ A accumulator
            ],
        ),
        compiler_params=pltpu.CompilerParams(
            dimension_semantics=dims,
            vmem_limit_bytes=vmem_limit,
        ),
    )(scale, x2d, weights.Wt, weights.At, weights.Bt)

    out2d = out2d[:M, :N]
    return out2d.reshape(*lead_shape, N)


def lora_linear(x, W, A, B, lora_scale=1.0, *,
                tm=512, tn=1024, tk=512, compute_dtype=None):
    """Convenience one-shot API matching the PyTorch module:
        x: (..., in_features); W: (out, in); A: (rank, in); B: (out, rank).
    For serving, call prepare_lora_weights() once and reuse it."""
    weights = prepare_lora_weights(W, A, B, tn=tn, tk=tk,
                                   compute_dtype=compute_dtype)
    return lora_linear_prepared(x, weights, lora_scale, tm=tm,
                                out_dtype=x.dtype)


def _reference(x, W, A, B, lora_scale):
    return x @ W.T + lora_scale * ((x @ A.T) @ B.T)


if __name__ == "__main__":
    key = jax.random.PRNGKey(0)

    # --- Small config consistent with the module's toy usage. ---
    in_features, out_features, rank, lora_scale = 32, 64, 4, 0.5
    kx, kw, ka, kb = jax.random.split(key, 4)
    x = jax.random.normal(kx, (2, 8, in_features), dtype=jnp.float32)
    W = jax.random.normal(kw, (out_features, in_features), dtype=jnp.float32) * 0.1
    A = jax.random.normal(ka, (rank, in_features), dtype=jnp.float32) * 0.1
    B0 = jnp.zeros((out_features, rank), dtype=jnp.float32)  # module zero-inits B

    out = lora_linear(x, W, A, B0, lora_scale)
    jax.block_until_ready(out)
    ref = _reference(x, W, A, B0, lora_scale)
    assert jnp.allclose(out, ref, atol=1e-5), "mismatch with B=0 reference"

    Bnz = jax.random.normal(kb, (out_features, rank), dtype=jnp.float32) * 0.1
    out_nz = lora_linear(x, W, A, Bnz, lora_scale)
    jax.block_until_ready(out_nz)
    ref_nz = _reference(x, W, A, Bnz, lora_scale)
    assert jnp.allclose(out_nz, ref_nz, atol=1e-5), "mismatch with nonzero-B ref"

    # --- Larger config: exercises K reduction axis + N/K padding. ---
    in2, out2, rank2 = 1024, 640, 8
    k2 = jax.random.split(key, 8)
    x2 = jax.random.normal(k2[4], (4, 100, in2), dtype=jnp.float32) * 0.5
    W2 = jax.random.normal(k2[5], (out2, in2), dtype=jnp.float32) * 0.05
    A2 = jax.random.normal(k2[6], (rank2, in2), dtype=jnp.float32) * 0.05
    B2 = jax.random.normal(k2[7], (out2, rank2), dtype=jnp.float32) * 0.05
    out_big = lora_linear(x2, W2, A2, B2, lora_scale)
    jax.block_until_ready(out_big)
    ref_big = _reference(x2, W2, A2, B2, lora_scale)
    assert jnp.allclose(out_big, ref_big, rtol=2e-2, atol=2e-2), \
        "mismatch on tiled/padded config"

    # --- Multi-tile config with prepared weights: exercises the
    #     reuse-x@A path (grid_m >= 2, grid_n >= 2, grid_k >= 2) and the
    #     runtime (SMEM) lora_scale with shared prepared weights. ---
    in3, out3, rank3 = 256, 256, 8
    k3 = jax.random.split(jax.random.PRNGKey(1), 4)
    x3 = jax.random.normal(k3[0], (3, 16, in3), dtype=jnp.float32) * 0.5
    W3 = jax.random.normal(k3[1], (out3, in3), dtype=jnp.float32) * 0.05
    A3 = jax.random.normal(k3[2], (rank3, in3), dtype=jnp.float32) * 0.05
    B3 = jax.random.normal(k3[3], (out3, rank3), dtype=jnp.float32) * 0.05
    weights3 = prepare_lora_weights(W3, A3, B3, tn=128, tk=128)
    out3a = lora_linear_prepared(x3, weights3, 0.75, tm=16)
    out3b = lora_linear_prepared(x3, weights3, 0.25, tm=16)
    jax.block_until_ready((out3a, out3b))
    assert jnp.allclose(out3a, _reference(x3, W3, A3, B3, 0.75),
                        rtol=2e-2, atol=2e-2), "mismatch on reuse-path (s=0.75)"
    assert jnp.allclose(out3b, _reference(x3, W3, A3, B3, 0.25),
                        rtol=2e-2, atol=2e-2), "mismatch on reuse-path (s=0.25)"

    # --- bf16 compute path (v6e/v7x recommendation); f32 accumulation kept,
    #     LoRA up-projection stays f32. ---
    out_bf16 = lora_linear(x, W, A, Bnz, lora_scale, compute_dtype=jnp.bfloat16)
    jax.block_until_ready(out_bf16)
    assert jnp.allclose(out_bf16.astype(jnp.float32), ref_nz,
                        rtol=5e-2, atol=5e-2), "mismatch on bf16 compute path"

    print("KERNEL_OK")
</pallas_src>

<mosaic_0001>
module attributes {stable_mosaic.version = 11 : i64} {
  func.func @_lora_linear_kernel(%arg0: i32, %arg1: i32, %arg2: i32, %arg3: memref<1xf32, #tpu.memory_space<smem>>, %arg4: memref<16x128xf32, #tpu.memory_space<vmem>>, %arg5: memref<128x128xf32, #tpu.memory_space<vmem>>, %arg6: memref<128x4xf32, #tpu.memory_space<vmem>>, %arg7: memref<4x128xf32, #tpu.memory_space<vmem>>, %arg8: memref<16x128xf32, #tpu.memory_space<vmem>>, %arg9: memref<16x128xf32, #tpu.memory_space<vmem>>, %arg10: memref<16x4xf32, #tpu.memory_space<vmem>>) attributes {dimension_semantics = [#tpu.dimension_semantics<parallel>, #tpu.dimension_semantics<parallel>, #tpu.dimension_semantics<arbitrary>], iteration_bounds = array<i64: 1, 1, 1>, scalar_prefetch = 0 : i64, scratch_operands = 2 : i64, tpu.core_type = #tpu.core_type<tc>, window_params = [{transform_indices = @transform_0, window_bounds = array<i64: 1>}, {transform_indices = @transform_1, window_bounds = array<i64: 16, 128>}, {transform_indices = @transform_2, window_bounds = array<i64: 128, 128>}, {transform_indices = @transform_3, window_bounds = array<i64: 128, 4>}, {transform_indices = @transform_4, window_bounds = array<i64: 4, 128>}, {transform_indices = @transform_5, window_bounds = array<i64: 16, 128>}]} {
    %c0_i32 = arith.constant 0 : i32
    %0 = arith.cmpi eq, %arg2, %c0_i32 : i32
    %1 = arith.extui %0 : i1 to i32
    %c0_i32_0 = arith.constant 0 : i32
    %2 = arith.cmpi ne, %1, %c0_i32_0 : i32
    scf.if %2 {
      %cst_19 = arith.constant 0.000000e+00 : f32
      %20 = vector.broadcast %cst_19 : f32 to vector<16x128xf32>
      %c0_20 = arith.constant 0 : index
      %c0_21 = arith.constant 0 : index
      %21 = vector.load %arg9[%c0_20, %c0_21] : memref<16x128xf32, #tpu.memory_space<vmem>>, vector<16x128xf32>
      tpu.vector_store %arg9[%c0_20, %c0_21], %20 {strides = array<i32>} : memref<16x128xf32, #tpu.memory_space<vmem>>, vector<16x128xf32>,
    } else {
    }
    %c0 = arith.constant 0 : index
    %c0_1 = arith.constant 0 : index
    %3 = vector.load %arg4[%c0, %c0_1] : memref<16x128xf32, #tpu.memory_space<vmem>>, vector<16x128xf32>
    %c0_2 = arith.constant 0 : index
    %c0_3 = arith.constant 0 : index
    %4 = vector.load %arg9[%c0_2, %c0_3] : memref<16x128xf32, #tpu.memory_space<vmem>>, vector<16x128xf32>
    %c0_4 = arith.constant 0 : index
    %c0_5 = arith.constant 0 : index
    %5 = vector.load %arg5[%c0_4, %c0_5] : memref<128x128xf32, #tpu.memory_space<vmem>>, vector<128x128xf32>
    %cst = arith.constant dense<0.000000e+00> : vector<16x128xf32>
    %6 = tpu.matmul %3, %5, %cst {dimension_numbers = #tpu.dot_dimension_numbers<[1], [0], [0], [1], [0, 0, 1, 1], [], []>} : vector<16x128xf32>, vector<128x128xf32>, vector<16x128xf32> -> vector<16x128xf32>
    %7 = arith.addf %4, %6 : vector<16x128xf32>
    %c0_6 = arith.constant 0 : index
    %c0_7 = arith.constant 0 : index
    %8 = vector.load %arg9[%c0_6, %c0_7] : memref<16x128xf32, #tpu.memory_space<vmem>>, vector<16x128xf32>
    tpu.vector_store %arg9[%c0_6, %c0_7], %7 {strides = array<i32>} : memref<16x128xf32, #tpu.memory_space<vmem>>, vector<16x128xf32>,
    %c0_i32_8 = arith.constant 0 : i32
    %9 = arith.cmpi eq, %arg2, %c0_i32_8 : i32
    %10 = arith.extui %9 : i1 to i32
    %c0_i32_9 = arith.constant 0 : i32
    %11 = arith.cmpi ne, %10, %c0_i32_9 : i32
    scf.if %11 {
      %cst_19 = arith.constant 0.000000e+00 : f32
      %20 = vector.broadcast %cst_19 : f32 to vector<16x4xf32>
      %c0_20 = arith.constant 0 : index
      %c0_21 = arith.constant 0 : index
      %21 = vector.load %arg10[%c0_20, %c0_21] : memref<16x4xf32, #tpu.memory_space<vmem>>, vector<16x4xf32>
      tpu.vector_store %arg10[%c0_20, %c0_21], %20 {strides = array<i32>} : memref<16x4xf32, #tpu.memory_space<vmem>>, vector<16x4xf32>,
    } else {
    }
    %c0_10 = arith.constant 0 : index
    %c0_11 = arith.constant 0 : index
    %12 = vector.load %arg10[%c0_10, %c0_11] : memref<16x4xf32, #tpu.memory_space<vmem>>, vector<16x4xf32>
    %c0_12 = arith.constant 0 : index
    %c0_13 = arith.constant 0 : index
    %13 = vector.load %arg6[%c0_12, %c0_13] : memref<128x4xf32, #tpu.memory_space<vmem>>, vector<128x4xf32>
    %cst_14 = arith.constant dense<0.000000e+00> : vector<16x4xf32>
    %14 = tpu.matmul %3, %13, %cst_14 {dimension_numbers = #tpu.dot_dimension_numbers<[1], [0], [0], [1], [0, 0, 1, 1], [], []>} : vector<16x128xf32>, vector<128x4xf32>, vector<16x4xf32> -> vector<16x4xf32>
    %15 = arith.addf %12, %14 : vector<16x4xf32>
    %c0_15 = arith.constant 0 : index
    %c0_16 = arith.constant 0 : index
    %16 = vector.load %arg10[%c0_15, %c0_16] : memref<16x4xf32, #tpu.memory_space<vmem>>, vector<16x4xf32>
    tpu.vector_store %arg10[%c0_15, %c0_16], %15 {strides = array<i32>} : memref<16x4xf32, #tpu.memory_space<vmem>>, vector<16x4xf32>,
    %c0_i32_17 = arith.constant 0 : i32
    %17 = arith.cmpi eq, %arg2, %c0_i32_17 : i32
    %18 = arith.extui %17 : i1 to i32
    %c0_i32_18 = arith.constant 0 : i32
    %19 = arith.cmpi ne, %18, %c0_i32_18 : i32
    scf.if %19 {
      %c0_19 = arith.constant 0 : index
      %20 = memref.load %arg3[%c0_19] : memref<1xf32, #tpu.memory_space<smem>>
      %c0_20 = arith.constant 0 : index
      %c0_21 = arith.constant 0 : index
      %21 = vector.load %arg10[%c0_20, %c0_21] : memref<16x4xf32, #tpu.memory_space<vmem>>, vector<16x4xf32>
      %22 = vector.broadcast %20 : f32 to vector<16x4xf32>
      %23 = arith.mulf %21, %22 : vector<16x4xf32>
      %c0_22 = arith.constant 0 : index
      %c0_23 = arith.constant 0 : index
      %24 = vector.load %arg7[%c0_22, %c0_23] : memref<4x128xf32, #tpu.memory_space<vmem>>, vector<4x128xf32>
      %cst_24 = arith.constant dense<0.000000e+00> : vector<16x128xf32>
      %25 = tpu.matmul %23, %24, %cst_24 {dimension_numbers = #tpu.dot_dimension_numbers<[1], [0], [0], [1], [0, 0, 1, 1], [], []>} : vector<16x4xf32>, vector<4x128xf32>, vector<16x128xf32> -> vector<16x128xf32>
      %c0_25 = arith.constant 0 : index
      %c0_26 = arith.constant 0 : index
      %26 = vector.load %arg9[%c0_25, %c0_26] : memref<16x128xf32, #tpu.memory_space<vmem>>, vector<16x128xf32>
      %27 = arith.addf %26, %25 : vector<16x128xf32>
      %c0_27 = arith.constant 0 : index
      %c0_28 = arith.constant 0 : index
      %28 = vector.load %arg8[%c0_27, %c0_28] : memref<16x128xf32, #tpu.memory_space<vmem>>, vector<16x128xf32>
      tpu.vector_store %arg8[%c0_27, %c0_28], %27 {strides = array<i32>} : memref<16x128xf32, #tpu.memory_space<vmem>>, vector<16x128xf32>,
    } else {
    }
    return
  }
  func.func @transform_0(%arg0: i32, %arg1: i32, %arg2: i32) -> i32 {
    %c0_i32 = arith.constant 0 : i32
    %c0_i32_0 = arith.constant 0 : i32
    return %c0_i32 : i32
  }
  func.func @transform_1(%arg0: i32, %arg1: i32, %arg2: i32) -> (i32, i32) {
    %c0_i32 = arith.constant 0 : i32
    return %arg0, %arg2 : i32, i32
  }
  func.func @transform_2(%arg0: i32, %arg1: i32, %arg2: i32) -> (i32, i32) {
    %c0_i32 = arith.constant 0 : i32
    return %arg2, %arg1 : i32, i32
  }
  func.func @transform_3(%arg0: i32, %arg1: i32, %arg2: i32) -> (i32, i32) {
    %c0_i32 = arith.constant 0 : i32
    %c0_i32_0 = arith.constant 0 : i32
    return %arg2, %c0_i32 : i32, i32
  }
  func.func @transform_4(%arg0: i32, %arg1: i32, %arg2: i32) -> (i32, i32) {
    %c0_i32 = arith.constant 0 : i32
    %c0_i32_0 = arith.constant 0 : i32
    return %c0_i32, %arg1 : i32, i32
  }
  func.func @transform_5(%arg0: i32, %arg1: i32, %arg2: i32) -> (i32, i32) {
    %c0_i32 = arith.constant 0 : i32
    return %arg0, %arg1 : i32, i32
  }
}

</mosaic_0001>

<bundles_post_ra>
// kernel: tpu_custom_call.1
= control target key start
LH: loop header
LB: loop body
LE: loop exit
PB: predicated region body
PF: predicated region fallthrough
CT: control target
= control target key end

     0   :  { %11 = vsyncpa [#allocation6], 0  ;;  %s688_s0 = inlined_call_operand.<no memory space> [shape: f32[1], index: 0, kind: input, shape index: {}]   ;;  %s689_s1 = inlined_call_operand.hbm [shape: f32[16,128], index: 1, kind: input, shape index: {}]   ;;  %s690_s2 = inlined_call_operand.vmem [shape: f32[128,128], index: 2, kind: input, shape index: {}]   ;;  %s691_s3 = inlined_call_operand.vmem [shape: f32[128,4], index: 3, kind: input, shape index: {}]   ;;  %s692_s4 = inlined_call_operand.vmem [shape: f32[4,128], index: 4, kind: input, shape index: {}]   ;;  %s693_s5 = inlined_call_operand.hbm [shape: f32[16,128], index: 5, kind: output, shape index: {}]  }
   0x1   :  { %12 = vsyncpa [#allocation7], 0  ;;  %s529_s18 = smov [#allocation5]  }
   0x2   :  { %s20_s19 = sshll.u32 %s529_s18, 4  ;;  %s21_s19 = int_to_ptr.vmem [resolvable:$true] %s20_s19 }
   0x3   :  { %s493_s20 = scalar_lea.vmem %s21_s19, 256  ;;  %p498_p1 = scmp.lt.s32.totalorder %s21_s19, %s21_s19 }
   0x4   :  { %p494_p0 = scmp.ne.s32.totalorder %s21_s19, %s493_s20  ;;  %p499_p2 = scmp.lt.s32.totalorder %s493_s20, %s493_s20 }
   0x6   :  { %p500_p3 = por %p499_p2, %p498_p1 }
   0x8   :  { %p501_p4 = pnand %p500_p3, %p494_p0 }
   0xa   :  { %504 = shalt.err (!%p501_p4)
}
   0xb   :  { %s530_s21 = smov 128   ;;  %s531_s22 = smov 8  }
   0xc   :  { %26 = dma.hbm_to_vmem [thread:$0]  %s689_s1, 256, %s21_s19, [#allocation6], %s530_s21, %s530_s21, %s531_s22  }
   0xd   :  { %525 = dma.done.wait [#allocation6], 256  }
   0xe   :  { %526 = vsyncadd [#allocation6], 4294967040  ;;  %vm144_vm0 = vcmask 31744   ;;  %v532_v0 = vmov 0.0   ;;  %v164_v1 = vld [vmem:[%s691_s3 + $0x78] sm:$0xff]  ;;  %v163_v2 = vld [vmem:[%s691_s3 + $0x70] sm:$0xff]  ;;  %v251_v43 = vstv %s688_s0 }
   0xf   :  { %146 = vst.msk [vmem:[#allocation3 + $0x8] sm:$0xff] %vm144_vm0, %v532_v0  ;;  %145 = vst.msk [vmem:[#allocation3] sm:$0xff] %vm144_vm0, %v532_v0  ;;  %440 = vmatprep.subr.mxu1 %v164_v1  ;;  %v162_v3 = vld [vmem:[%s691_s3 + $0x68] sm:$0xff]  ;;  %v161_v4 = vld [vmem:[%s691_s3 + $0x60] sm:$0xff]  ;;  %vm261_vm1 = vcmask 1043456  }
  0x10   :  { %441 = vmatpush3.msra.mxu1 %v164_v1  ;;  %v584_v5 = vld [vmem:[#allocation5] sm:$0xff]  ;;  %v160_v6 = vld [vmem:[%s691_s3 + $0x58] sm:$0xff]  ;;  %v59_v10 = vld [vmem:[%s690_s2 + $0x68] sm:$0xff] }
  0x11   :  { %442 = vmatprep.subr.mxu1 %v163_v2  ;;  %472 = vmatprep.mubr.f32.mxu1 %v584_v5  ;;  %v61_v7 = vld [vmem:[%s690_s2 + $0x78] sm:$0xff]  ;;  %v60_v8 = vld [vmem:[%s690_s2 + $0x70] sm:$0xff]  ;;  %v158_v11 = vld [vmem:[%s691_s3 + $0x48] sm:$0xff] }
  0x12   :  { %443 = vmatpush3.msra.mxu1 %v163_v2  ;;  %405 = vmatprep.subr.mxu0 %v61_v7  ;;  %v159_v9 = vld [vmem:[%s691_s3 + $0x50] sm:$0xff]  ;;  %v58_v12 = vld [vmem:[%s690_s2 + $0x60] sm:$0xff]  ;;  %v57_v14 = vld [vmem:[%s690_s2 + $0x58] sm:$0xff] }
  0x13   :  { %444 = vmatprep.subr.mxu1 %v162_v3  ;;  %406 = vmatpush3.msra.mxu0 %v61_v7  ;;  %v157_v13 = vld [vmem:[%s691_s3 + $0x40] sm:$0xff]  ;;  %v156_v15 = vld [vmem:[%s691_s3 + $0x38] sm:$0xff]  ;;  %v56_v16 = vld [vmem:[%s690_s2 + $0x50] sm:$0xff] }
  0x14   :  { %445 = vmatpush3.msra.mxu1 %v162_v3  ;;  %407 = vmatprep.subr.mxu0 %v60_v8  ;;  %v155_v17 = vld [vmem:[%s691_s3 + $0x30] sm:$0xff]  ;;  %v55_v18 = vld [vmem:[%s690_s2 + $0x48] sm:$0xff]  ;;  %v54_v20 = vld [vmem:[%s690_s2 + $0x40] sm:$0xff] }
  0x15   :  { %446 = vmatprep.subr.mxu1 %v161_v4  ;;  %408 = vmatpush3.msra.mxu0 %v60_v8  ;;  %v154_v19 = vld [vmem:[%s691_s3 + $0x28] sm:$0xff]  ;;  %v153_v21 = vld [vmem:[%s691_s3 + $0x20] sm:$0xff]  ;;  %v53_v22 = vld [vmem:[%s690_s2 + $0x38] sm:$0xff] }
  0x16   :  { %447 = vmatpush3.msra.mxu1 %v161_v4  ;;  %409 = vmatprep.subr.mxu0 %v59_v10  ;;  %v152_v23 = vld [vmem:[%s691_s3 + $0x18] sm:$0xff]  ;;  %v52_v24 = vld [vmem:[%s690_s2 + $0x30] sm:$0xff]  ;;  %v51_v26 = vld [vmem:[%s690_s2 + $0x28] sm:$0xff] }
  0x17   :  { %448 = vmatprep.subr.mxu1 %v160_v6  ;;  %410 = vmatpush3.msra.mxu0 %v59_v10  ;;  %v151_v25 = vld [vmem:[%s691_s3 + $0x10] sm:$0xff]  ;;  %v150_v27 = vld [vmem:[%s691_s3 + $0x8] sm:$0xff]  ;;  %v50_v28 = vld [vmem:[%s690_s2 + $0x20] sm:$0xff] }
  0x18   :  { %449 = vmatpush3.msra.mxu1 %v160_v6  ;;  %411 = vmatprep.subr.mxu0 %v58_v12  ;;  %v149_v29 = vld [vmem:[%s691_s3] sm:$0xff]  ;;  %v43_v30 = vld [vmem:[#allocation5 + $0x8] sm:$0xff]  ;;  %v48_v32 = vld [vmem:[%s690_s2 + $0x10] sm:$0xff] }
  0x19   :  { %450 = vmatprep.subr.mxu1 %v159_v9  ;;  %412 = vmatpush3.msra.mxu0 %v58_v12  ;;  %v49_v31 = vld [vmem:[%s690_s2 + $0x18] sm:$0xff]  ;;  %v47_v33 = vld [vmem:[%s690_s2 + $0x8] sm:$0xff]  ;;  %v46_v34 = vld [vmem:[%s690_s2] sm:$0xff] }
  0x1a   :  { %451 = vmatpush3.msra.mxu1 %v159_v9  ;;  %413 = vmatprep.subr.mxu0 %v57_v14  ;;  %v254_v35 = vld [vmem:[%s692_s4] sm:$0xf]  ;;  %v148_v36 = vld [vmem:[#allocation3 + $0x8] sm:$0xff]  ;;  %s533_s4 = smov [#allocation8]  }
  0x1b   :  { %452 = vmatprep.subr.mxu1 %v158_v11  ;;  %414 = vmatpush3.msra.mxu0 %v57_v14  ;;  %v147_v38 = vld [vmem:[#allocation3] sm:$0xff]  ;;  %s351_s17 = sshll.u32 %s533_s4, 4  ;;  %s352_s17 = int_to_ptr.vmem [resolvable:$true] %s351_s17 }
  0x1c   :  { %453 = vmatpush3.msra.mxu1 %v158_v11  ;;  %415 = vmatprep.subr.mxu0 %v56_v16  ;;  %s505_s18 = scalar_lea.vmem %s352_s17, 256  ;;  %p510_p6 = scmp.lt.s32.totalorder %s352_s17, %s352_s17 }
  0x1d   :  { %454 = vmatprep.subr.mxu1 %v157_v13  ;;  %416 = vmatpush3.msra.mxu0 %v56_v16  ;;  %p506_p5 = scmp.ne.s32.totalorder %s352_s17, %s505_s18  ;;  %p511_p7 = scmp.lt.s32.totalorder %s505_s18, %s505_s18 }
  0x1e   :  { %455 = vmatpush3.msra.mxu1 %v157_v13  ;;  %417 = vmatprep.subr.mxu0 %v55_v18 }
  0x1f   :  { %456 = vmatprep.subr.mxu1 %v156_v15  ;;  %418 = vmatpush3.msra.mxu0 %v55_v18  ;;  %p512_p8 = por %p511_p7, %p510_p6 }
  0x20   :  { %457 = vmatpush3.msra.mxu1 %v156_v15  ;;  %419 = vmatprep.subr.mxu0 %v54_v20 }
  0x21   :  { %458 = vmatprep.subr.mxu1 %v155_v17  ;;  %420 = vmatpush3.msra.mxu0 %v54_v20  ;;  %p513_p9 = pnand %p512_p8, %p506_p5 }
  0x22   :  { %459 = vmatpush3.msra.mxu1 %v155_v17  ;;  %421 = vmatprep.subr.mxu0 %v53_v22 }
  0x23   :  { %460 = vmatprep.subr.mxu1 %v154_v19  ;;  %422 = vmatpush3.msra.mxu0 %v53_v22 }
  0x24   :  { %461 = vmatpush3.msra.mxu1 %v154_v19  ;;  %423 = vmatprep.subr.mxu0 %v52_v24 }
  0x25   :  { %462 = vmatprep.subr.mxu1 %v153_v21  ;;  %424 = vmatpush3.msra.mxu0 %v52_v24 }
  0x26   :  { %463 = vmatpush3.msra.mxu1 %v153_v21  ;;  %425 = vmatprep.subr.mxu0 %v51_v26 }
  0x27   :  { %464 = vmatprep.subr.mxu1 %v152_v23  ;;  %426 = vmatpush3.msra.mxu0 %v51_v26 }
  0x28   :  { %465 = vmatpush3.msra.mxu1 %v152_v23  ;;  %427 = vmatprep.subr.mxu0 %v50_v28 }
  0x29   :  { %466 = vmatprep.subr.mxu1 %v151_v25  ;;  %428 = vmatpush3.msra.mxu0 %v50_v28 }
  0x2a   :  { %467 = vmatpush3.msra.mxu1 %v151_v25  ;;  %437 = vmatprep.mubr.f32.mxu0 %v584_v5 }
  0x2b   :  { %468 = vmatprep.subr.mxu1 %v150_v27  ;;  %429 = vmatprep.subr.mxu0 %v49_v31 }
  0x2c   :  { %469 = vmatpush3.msra.mxu1 %v150_v27  ;;  %430 = vmatpush3.msra.mxu0 %v49_v31 }
  0x2d   :  { %470 = vmatprep.subr.mxu1 %v149_v29  ;;  %431 = vmatprep.subr.mxu0 %v48_v32 }
  0x2e   :  { %471 = vmatpush3.msra.mxu1 %v149_v29  ;;  %432 = vmatpush3.msra.mxu0 %v48_v32 }
  0x2f   :  { %473 = vmatmul.mubr.f32.vlgmr.msra.gmra.mxu1 %v43_v30  ;;  %433 = vmatprep.subr.mxu0 %v47_v33 }
  0x30   :  { %434 = vmatpush3.msra.mxu0 %v47_v33 }
  0x31   :  { %435 = vmatprep.subr.mxu0 %v46_v34 }
  0x32   :  { %436 = vmatpush3.msra.mxu0 %v46_v34 }
  0x33   :  { %438 = vmatmul.mubr.f32.vlgmr.msra.gmra.mxu0 %v43_v30  ;;  %475 = vmatprep.subr.msk.mxu0 %vm261_vm1, %v254_v35 }
  0x34   :  { %476 = vmatpush3.msk.msra.mxu0 %vm261_vm1, %v254_v35 }
  0xef   :  { %v474_v37 = vpop.f32.mrf.mxu1 }
  0xf0   :  { %v241_v39 = vadd.f32 %v474_v37, %v148_v36 }
  0xf1   :  { %v231_v40 = vpop.f32.mrf.mxu1 }
  0xf2   :  { %244 = vst.msk [vmem:[#allocation3 + $0x8] sm:$0xff] %vm144_vm0, %v241_v39  ;;  %v240_v41 = vadd.f32 %v231_v40, %v147_v38 }
  0xf3   :  { %v439_v47 = vpop.f32.mrf.mxu0 }
  0xf4   :  { %243 = vst.msk [vmem:[#allocation3] sm:$0xff] %vm144_vm0, %v240_v41 }
  0xf5   :  { %v128_v48 = vpop.f32.mrf.mxu0 }
  0xf9   :  { %v250_v42 = vld [vmem:[#allocation3 + $0x8] sm:$0xff] }
  0xfa   :  { %v253_v46 = vmul.f32 %v251_v43, %v250_v42 }
  0xfb   :  { %v249_v44 = vld [vmem:[#allocation3] sm:$0xff] }
  0xfc   :  { %v252_v45 = vmul.f32 %v251_v43, %v249_v44 }
  0xfe   :  { %477 = vmatprep.mubr.msk.f32.mxu0 %vm144_vm0, %v252_v45 }
  0xff   :  { %478 = vmatmul.mubr.msk.f32.vlgmr.msra.gmra.mxu0 %vm144_vm0, %v253_v46 }
 0x1bf   :  { %v479_v49 = vpop.f32.mrf.mxu0 }
 0x1c0   :  { %v343_v50 = vadd.f32 %v479_v49, %v439_v47 }
 0x1c1   :  { %v331_v51 = vpop.f32.mrf.mxu0 }
 0x1c2   :  { %345 = vst [vmem:[#allocation8 + $0x8] sm:$0xff] %v343_v50  ;;  %v342_v52 = vadd.f32 %v331_v51, %v128_v48 }
 0x1c4   :  { %344 = vst [vmem:[#allocation8] sm:$0xff] %v342_v52 }
 0x1c5   :  { %516 = shalt.err (!%p513_p9)
}
 0x1c6   :  { %357 = dma.vmem_to_hbm [thread:$0]  %s352_s17, 256, %s693_s5, [#allocation7], %s530_s21, %s530_s21, %s531_s22  }
 0x1c7   :  { %527 = dma.done.wait [#allocation7], 256  }
 0x1c8   :  { %528 = vsyncadd [#allocation7], 4294967040 }
 0x1c9   :  { %361 = vsyncpa [#allocation6], 1 }
 0x1ca   :  { %362 = vsyncpa [#allocation7], 1 }

</bundles_post_ra>
